<compile_context>
chip_gen: v5e
topology: v5e:2x2
jax: 0.10.0
libtpu: 0.0.40
codegen_flags: <defaults>
</compile_context>

<pallas_src>
import functools

import jax
import jax.numpy as jnp
from jax.experimental import pallas as pl
from jax.experimental.pallas import tpu as pltpu


def _round_up(x, m):
    return ((x + m - 1) // m) * m


def _largest_divisor_leq(n, cap):
    cap = max(1, min(n, cap))
    for d in range(cap, 0, -1):
        if n % d == 0:
            return d
    return 1


def _edge_shift(arr, d):
    """result[..., q, :] = arr[..., clamp(q + d, 0, n-1), :] for a *static* int shift d."""
    lead = arr.shape[:-2]
    n, c = arr.shape[-2], arr.shape[-1]
    if d == 0:
        return arr
    if d < 0:
        d = min(-d, n)
        top = jnp.broadcast_to(arr[..., 0:1, :], lead + (d, c))
        if d >= n:
            return top
        return jnp.concatenate([top, arr[..., : n - d, :]], axis=-2)
    d = min(d, n)
    bot = jnp.broadcast_to(arr[..., n - 1 : n, :], lead + (d, c))
    if d >= n:
        return bot
    return jnp.concatenate([arr[..., d:, :], bot], axis=-2)


def _moving_avg_kernel(x_ref, o_ref, *, L, C, K, stride, pad, T, T_in, n_t, bb):
    """x_ref: (bb, L, C) full sequences (VMEM); o_ref: (bb, T, C) output time tile.

    out[b, i] = mean_k x[b, clamp(stride*(t0 + i) + k - pad, 0, L-1)]  (replicate padding).
    """
    if n_t == 1:
        # Single time tile: build the replicate-padded sequence directly (static shapes).
        xf = x_ref[...].astype(jnp.float32)                              # (bb, L, C)
        parts = []
        if pad > 0:
            parts.append(jnp.broadcast_to(xf[:, 0:1, :], (bb, pad, C)))
        parts.append(xf)
        if pad > 0:
            parts.append(jnp.broadcast_to(xf[:, L - 1 : L, :], (bb, pad, C)))
        P = jnp.concatenate(parts, axis=1) if len(parts) > 1 else xf     # (bb, L+2*pad, C)
    else:
        # Time-tiled path (bb == 1): contiguous window read with a clamped dynamic start,
        # then static edge-replicated fixups for the few tiles that poke past the sequence.
        t = pl.program_id(1)
        a_dyn = stride * T * t - pad                      # window start, unpadded coords
        c_dyn = jnp.clip(a_dyn, 0, L - T_in)              # wrapper guarantees T_in <= L
        base = x_ref[:, pl.ds(c_dyn, T_in), :].astype(jnp.float32)       # (1, T_in, C)
        P = base
        for tt in range(n_t):                             # trace-time loop; <= ~3 selects
            a = stride * T * tt - pad
            d = a - min(max(a, 0), L - T_in)
            if d != 0:
                P = jnp.where(t == tt, _edge_shift(base, d), P)

    if stride == 1:
        # Dense accumulate over the K-window (K small & static; VPU work is free filler).
        acc = P[:, 0:T, :]
        for k in range(1, K):
            acc = acc + P[:, k : k + T, :]
        o_ref[...] = (acc * (1.0 / K)).astype(o_ref.dtype)
    else:
        # stride > 1: express the pool as a static banded matmul on the (idle) MXU.
        # sel[i, j] = 1/K  iff  stride*i <= j < stride*i + K.
        p_rows = P.shape[1]
        rows = jax.lax.broadcasted_iota(jnp.int32, (T, p_rows), 0)
        cols = jax.lax.broadcasted_iota(jnp.int32, (T, p_rows), 1)
        sel = jnp.where((cols >= rows * stride) & (cols < rows * stride + K),
                        jnp.float32(1.0 / K), jnp.float32(0.0))
        for b in range(bb):                               # bb is small (capped) here
            out_b = jnp.dot(sel, P[b], preferred_element_type=jnp.float32)  # (T, C)
            o_ref[b, :, :] = out_b.astype(o_ref.dtype)


def moving_avg(x, kernel_size, stride, *, time_tile=512):
    """Equivalent of moving_avg(kernel_size, stride).forward(x) for x of shape [B, L, C]."""
    B, L, C = x.shape
    K = int(kernel_size)
    stride = int(stride)
    pad = (K - 1) // 2
    l_pad = L + 2 * pad
    L_out = (l_pad - K) // stride + 1
    assert L_out >= 1, "kernel_size too large for this sequence length"

    # Time tiling over the *output* rows (>=512-row tiles when the sequence is long).
    n_t, T = 1, L_out
    if L_out > time_tile:
        T_cand = _round_up(pl.cdiv(L_out, pl.cdiv(L_out, time_tile)), 8)
        n_cand = pl.cdiv(L_out, T_cand)
        T_in_cand = stride * (T_cand - 1) + K
        # Guards: per-tile input window must fit inside the sequence and the replicate
        # padding must only touch boundary tiles; otherwise fall back to a single tile.
        if n_cand > 1 and T_in_cand <= L and pad < stride * T_cand:
            n_t, T = n_cand, T_cand
    L_out_pad = n_t * T
    T_in = stride * (T - 1) + K

    # Batch-block tiling: only when the full sequence is one time tile.  Pick the
    # largest divisor of B whose per-step footprint fits a conservative VMEM budget.
    bb = 1
    if n_t == 1:
        in_bytes = x.dtype.itemsize
        n_rows = (L_out - 1) * stride + 1
        per_batch = (2 * L * C * in_bytes            # double-buffered input block
                     + 2 * L_out * C * in_bytes      # double-buffered output block
                     + (L + 2 * pad) * C * 4         # padded sequence P (f32)
                     + n_rows * C * 4)               # accumulator (f32)
        bb_cap = max(1, (8 * 1024 * 1024) // max(per_batch, 1))
        if stride > 1:
            bb_cap = min(bb_cap, 8)                  # bound trace-time matmul unrolling
        bb = _largest_divisor_leq(B, bb_cap)

    kernel = functools.partial(
        _moving_avg_kernel, L=L, C=C, K=K, stride=stride, pad=pad,
        T=T, T_in=T_in, n_t=n_t, bb=bb)

    out = pl.pallas_call(
        kernel,
        out_shape=jax.ShapeDtypeStruct((B, L_out_pad, C), x.dtype),
        grid=(B // bb, n_t),
        # Full sequence(s) per batch-block; block index is constant across the t axis,
        # so the input is DMA'd from HBM once per batch-block (no padded copy in HBM).
        in_specs=[pl.BlockSpec((bb, L, C), lambda b, t: (b, 0, 0))],
        out_specs=pl.BlockSpec((bb, T, C), lambda b, t: (b, t, 0)),
        compiler_params=pltpu.CompilerParams(
            dimension_semantics=("parallel", "parallel"),
            vmem_limit_bytes=32 * 1024 * 1024),
    )(x)

    if L_out_pad != L_out:
        out = out[:, :L_out, :]
    return out


def _reference(x, kernel_size, stride):
    """Pure-JAX reference mirroring the torch module exactly (vectorized gather)."""
    pad = (kernel_size - 1) // 2
    front = jnp.repeat(x[:, 0:1, :], pad, axis=1)
    end = jnp.repeat(x[:, -1:, :], pad, axis=1)
    xpad = jnp.concatenate([front, x, end], axis=1)
    l_pad = xpad.shape[1]
    l_out = (l_pad - kernel_size) // stride + 1
    idx = jnp.arange(l_out)[:, None] * stride + jnp.arange(kernel_size)[None, :]
    return xpad[:, idx, :].mean(axis=2)


def _run_case(key, B, L, C, K, stride):
    x = jax.random.normal(key, (B, L, C), dtype=jnp.float32)
    out = jax.block_until_ready(moving_avg(x, K, stride))
    ref = _reference(x, K, stride)
    assert out.shape == ref.shape, (out.shape, ref.shape)
    assert jnp.allclose(out, ref, atol=1e-5, rtol=1e-5), \
        f"mismatch vs reference (B={B}, L={L}, C={C}, K={K}, stride={stride})"


if __name__ == "__main__":
    # moving_avg has no learnable parameters (AvgPool1d only), so nothing to initialize.
    key = jax.random.PRNGKey(0)
    k0, k1, k2 = jax.random.split(key, 3)

    # 1) Typical decomposition setting at small shape (single tile, batch-blocked path).
    _run_case(k0, B=2, L=16, C=8, K=5, stride=1)
    # 2) Long sequence -> exercises the time-tiled path with replicate-pad boundary fixups.
    _run_case(k1, B=4, L=1600, C=8, K=25, stride=1)
    # 3) stride > 1 -> exercises the banded-matmul pooling path.
    _run_case(k2, B=2, L=16, C=8, K=5, stride=2)

    print("KERNEL_OK")
</pallas_src>

<mosaic_0001>
module attributes {stable_mosaic.version = 11 : i64} {
  func.func @_moving_avg_kernel(%arg0: i32, %arg1: i32, %arg2: memref<2x16x8xf32, #tpu.memory_space<vmem>>, %arg3: memref<2x16x8xf32, #tpu.memory_space<vmem>>) attributes {dimension_semantics = [#tpu.dimension_semantics<parallel>, #tpu.dimension_semantics<parallel>], iteration_bounds = array<i64: 1, 1>, scalar_prefetch = 0 : i64, scratch_operands = 0 : i64, tpu.core_type = #tpu.core_type<tc>, window_params = [{transform_indices = @transform_0, window_bounds = array<i64: 2, 16, 8>}, {transform_indices = @transform_1, window_bounds = array<i64: 2, 16, 8>}]} {
    %c0 = arith.constant 0 : index
    %c0_0 = arith.constant 0 : index
    %c0_1 = arith.constant 0 : index
    %0 = vector.load %arg2[%c0, %c0_0, %c0_1] : memref<2x16x8xf32, #tpu.memory_space<vmem>>, vector<2x16x8xf32>
    %1 = vector.extract_strided_slice %0 {offsets = [0, 0, 0], sizes = [2, 1, 8], strides = [1, 1, 1]} : vector<2x16x8xf32> to vector<2x1x8xf32>
    %2 = vector.shape_cast %1 : vector<2x1x8xf32> to vector<2x1x8xf32>
    %3 = vector.broadcast %2 : vector<2x1x8xf32> to vector<2x2x8xf32>
    %4 = vector.extract_strided_slice %0 {offsets = [0, 15, 0], sizes = [2, 1, 8], strides = [1, 1, 1]} : vector<2x16x8xf32> to vector<2x1x8xf32>
    %5 = vector.shape_cast %4 : vector<2x1x8xf32> to vector<2x1x8xf32>
    %6 = vector.broadcast %5 : vector<2x1x8xf32> to vector<2x2x8xf32>
    %7 = tpu.concatenate %3, %0, %6 in 1 : vector<2x2x8xf32>, vector<2x16x8xf32>, vector<2x2x8xf32> -> vector<2x20x8xf32>
    %8 = vector.extract_strided_slice %7 {offsets = [0, 0, 0], sizes = [2, 16, 8], strides = [1, 1, 1]} : vector<2x20x8xf32> to vector<2x16x8xf32>
    %9 = vector.extract_strided_slice %7 {offsets = [0, 1, 0], sizes = [2, 16, 8], strides = [1, 1, 1]} : vector<2x20x8xf32> to vector<2x16x8xf32>
    %10 = arith.addf %8, %9 : vector<2x16x8xf32>
    %11 = vector.extract_strided_slice %7 {offsets = [0, 2, 0], sizes = [2, 16, 8], strides = [1, 1, 1]} : vector<2x20x8xf32> to vector<2x16x8xf32>
    %12 = arith.addf %10, %11 : vector<2x16x8xf32>
    %13 = vector.extract_strided_slice %7 {offsets = [0, 3, 0], sizes = [2, 16, 8], strides = [1, 1, 1]} : vector<2x20x8xf32> to vector<2x16x8xf32>
    %14 = arith.addf %12, %13 : vector<2x16x8xf32>
    %15 = vector.extract_strided_slice %7 {offsets = [0, 4, 0], sizes = [2, 16, 8], strides = [1, 1, 1]} : vector<2x20x8xf32> to vector<2x16x8xf32>
    %16 = arith.addf %14, %15 : vector<2x16x8xf32>
    %cst = arith.constant 2.000000e-01 : f32
    %17 = vector.broadcast %cst : f32 to vector<2x16x8xf32>
    %18 = arith.mulf %16, %17 : vector<2x16x8xf32>
    %c0_2 = arith.constant 0 : index
    %c0_3 = arith.constant 0 : index
    %c0_4 = arith.constant 0 : index
    %19 = vector.load %arg3[%c0_2, %c0_3, %c0_4] : memref<2x16x8xf32, #tpu.memory_space<vmem>>, vector<2x16x8xf32>
    tpu.vector_store %arg3[%c0_2, %c0_3, %c0_4], %18 {strides = array<i32>} : memref<2x16x8xf32, #tpu.memory_space<vmem>>, vector<2x16x8xf32>,
    return
  }
  func.func @transform_0(%arg0: i32, %arg1: i32) -> (i32, i32, i32) {
    %c0_i32 = arith.constant 0 : i32
    %c0_i32_0 = arith.constant 0 : i32
    %c0_i32_1 = arith.constant 0 : i32
    return %arg0, %c0_i32, %c0_i32_0 : i32, i32, i32
  }
  func.func @transform_1(%arg0: i32, %arg1: i32) -> (i32, i32, i32) {
    %c0_i32 = arith.constant 0 : i32
    %c0_i32_0 = arith.constant 0 : i32
    return %arg0, %arg1, %c0_i32 : i32, i32, i32
  }
}

</mosaic_0001>

<bundles_post_ra>
// kernel: tpu_custom_call.1
= control target key start
LH: loop header
LB: loop body
LE: loop exit
PB: predicated region body
PF: predicated region fallthrough
CT: control target
= control target key end

     0   :  { %vm20_vm0 = vcmask 1041408   ;;  %vm41_vm1 = vcmask 1046528   ;;  %vm60_vm2 = vcmask 1045504   ;;  %vm79_vm3 = vcmask 1044480   ;;  %s190_s0 = inlined_call_operand.vmem [shape: f32[2,16,8], index: 0, kind: input, shape index: {}]   ;;  %s191_s1 = inlined_call_operand.vmem [shape: f32[2,16,8], index: 1, kind: output, shape index: {}]  }
   0x1   :  { %v8_v0 = vld [vmem:[%s190_s0] sm:$0xff]  ;;  %v9_v1 = vld [vmem:[%s190_s0 + $0x8] sm:$0xff]  ;;  %v10_v2 = vld [vmem:[%s190_s0 + $0x10] sm:$0xff]  ;;  %vm98_vm4 = vcmask 1043456   ;;  %vm121_vm5 = vcmask 64512  }
   0x2   :  { %v12_v3 = vperm.slane %v8_v0, 0  ;;  %v21_v4 = vrot.slane %v8_v0, 6  ;;  %v22_v5 = vrot.slane %v9_v1, 6  ;;  %v14_v6 = vperm.slane %v9_v1, 7  ;;  %v11_v7 = vld [vmem:[%s190_s0 + $0x18] sm:$0xff] }
   0x3   :  { %v13_v8 = vperm.slane %v10_v2, 0  ;;  %v24_v9 = vrot.slane %v10_v2, 6  ;;  %v25_v10 = vrot.slane %v11_v7, 6  ;;  %v15_v14 = vperm.slane %v11_v7, 7 }
   0x4   :  { %v23_v11 = vsel %vm20_vm0, %v21_v4, %v22_v5  ;;  %v33_v12 = vsel %vm20_vm0, %v12_v3, %v21_v4  ;;  %v35_v13 = vsel %vm20_vm0, %v22_v5, %v14_v6 }
   0x5   :  { %v42_v15 = vrot.slane %v33_v12, 1  ;;  %v43_v16 = vrot.slane %v23_v11, 1  ;;  %v61_v17 = vrot.slane %v33_v12, 2  ;;  %v62_v18 = vrot.slane %v23_v11, 2 }
   0x6   :  { %v80_v19 = vrot.slane %v33_v12, 3  ;;  %v81_v20 = vrot.slane %v23_v11, 3  ;;  %v99_v21 = vrot.slane %v33_v12, 4  ;;  %v100_v22 = vrot.slane %v23_v11, 4 }
   0x7   :  { %v44_v23 = vsel %vm41_vm1, %v42_v15, %v43_v16  ;;  %v63_v24 = vsel %vm60_vm2, %v61_v17, %v62_v18  ;;  %v45_v25 = vrot.slane %v35_v13, 1  ;;  %v64_v26 = vrot.slane %v35_v13, 2 }
   0x8   :  { %v56_v27 = vadd.f32 %v44_v23, %v33_v12  ;;  %v82_v28 = vsel %vm79_vm3, %v80_v19, %v81_v20  ;;  %v101_v29 = vsel %vm98_vm4, %v99_v21, %v100_v22  ;;  %v83_v30 = vrot.slane %v35_v13, 3 }
   0x9   :  { %v46_v31 = vsel %vm41_vm1, %v43_v16, %v45_v25  ;;  %v65_v32 = vsel %vm60_vm2, %v62_v18, %v64_v26  ;;  %v102_v33 = vrot.slane %v35_v13, 4  ;;  %v26_v34 = vsel %vm20_vm0, %v24_v9, %v25_v10 }
   0xa   :  { %v75_v35 = vadd.f32 %v63_v24, %v56_v27  ;;  %v57_v36 = vadd.f32 %v46_v31, %v23_v11  ;;  %v84_v37 = vsel %vm79_vm3, %v81_v20, %v83_v30  ;;  %v34_v38 = vsel %vm20_vm0, %v13_v8, %v24_v9 }
   0xb   :  { %v103_v39 = vsel %vm98_vm4, %v100_v22, %v102_v33  ;;  %v47_v40 = vrot.slane %v34_v38, 1  ;;  %v48_v41 = vrot.slane %v26_v34, 1  ;;  %v66_v42 = vrot.slane %v34_v38, 2 }
   0xc   :  { %v94_v43 = vadd.f32 %v82_v28, %v75_v35  ;;  %v76_v44 = vadd.f32 %v65_v32, %v57_v36  ;;  %v67_v45 = vrot.slane %v26_v34, 2  ;;  %v85_v46 = vrot.slane %v34_v38, 3 }
   0xd   :  { %v49_v47 = vsel %vm41_vm1, %v47_v40, %v48_v41  ;;  %v86_v48 = vrot.slane %v26_v34, 3  ;;  %v104_v49 = vrot.slane %v34_v38, 4  ;;  %v105_v50 = vrot.slane %v26_v34, 4 }
   0xe   :  { %v113_v51 = vadd.f32 %v101_v29, %v94_v43  ;;  %v95_v52 = vadd.f32 %v84_v37, %v76_v44  ;;  %v58_v53 = vadd.f32 %v49_v47, %v34_v38  ;;  %v68_v54 = vsel %vm60_vm2, %v66_v42, %v67_v45 }
   0xf   :  { %v87_v55 = vsel %vm79_vm3, %v85_v46, %v86_v48  ;;  %v36_v56 = vsel %vm20_vm0, %v25_v10, %v15_v14  ;;  %v106_v61 = vsel %vm98_vm4, %v104_v49, %v105_v50 }
  0x10   :  { %v117_v57 = vmul.f32 0.2, %v113_v51  ;;  %v114_v58 = vadd.f32 %v103_v39, %v95_v52  ;;  %v77_v59 = vadd.f32 %v68_v54, %v58_v53  ;;  %v50_v60 = vrot.slane %v36_v56, 1 }
  0x11   :  { %v69_v62 = vrot.slane %v36_v56, 2  ;;  %v88_v63 = vrot.slane %v36_v56, 3  ;;  %v107_v3 = vrot.slane %v36_v56, 4 }
  0x12   :  { %122 = vst.msk [vmem:[%s191_s1] sm:$0xff] %vm121_vm5, %v117_v57  ;;  %v118_v0 = vmul.f32 0.2, %v114_v58  ;;  %v96_v1 = vadd.f32 %v87_v55, %v77_v59  ;;  %v51_v2 = vsel %vm41_vm1, %v48_v41, %v50_v60 }
  0x13   :  { %v59_v4 = vadd.f32 %v51_v2, %v26_v34  ;;  %v70_v5 = vsel %vm60_vm2, %v67_v45, %v69_v62  ;;  %v89_v7 = vsel %vm79_vm3, %v86_v48, %v88_v63  ;;  %v108_v10 = vsel %vm98_vm4, %v105_v50, %v107_v3 }
  0x14   :  { %123 = vst.msk [vmem:[%s191_s1 + $0x8] sm:$0xff] %vm121_vm5, %v118_v0  ;;  %v115_v6 = vadd.f32 %v106_v61, %v96_v1 }
  0x15   :  { %v78_v8 = vadd.f32 %v70_v5, %v59_v4 }
  0x16   :  { %v119_v9 = vmul.f32 0.2, %v115_v6 }
  0x17   :  { %v97_v11 = vadd.f32 %v89_v7, %v78_v8 }
  0x18   :  { %124 = vst.msk [vmem:[%s191_s1 + $0x10] sm:$0xff] %vm121_vm5, %v119_v9 }
  0x19   :  { %v116_v12 = vadd.f32 %v108_v10, %v97_v11 }
  0x1b   :  { %v120_v13 = vmul.f32 0.2, %v116_v12 }
  0x1d   :  { %125 = vst.msk [vmem:[%s191_s1 + $0x18] sm:$0xff] %vm121_vm5, %v120_v13 }

</bundles_post_ra>
